<compile_context>
chip_gen: v5e
topology: v5e:2x2
jax: 0.10.0
libtpu: 0.0.40
codegen_flags: <defaults>
</compile_context>

<pallas_src>
import functools

import jax
import jax.numpy as jnp
from jax.experimental import pallas as pl
from jax.experimental.pallas import tpu as pltpu

HIDDEN = 128


def _round_up(x, m):
    return ((x + m - 1) // m) * m


def _device_kind():
    try:
        return jax.devices()[0].device_kind.lower()
    except Exception:
        return ""


def qnet_kernel(x_ref, w1_ref, wmid_ref, w5_ref, b_ref, out_ref, *,
                compute_dtype, action_size):
    """One batch tile: 5 MXU matmuls (bf16 operands, f32 acc), bias/ReLU chain in
    `compute_dtype` (bf16 on v6e/v7x, f32 on v5e), tanh-based sigmoid, narrow store."""
    b = b_ref[...].astype(compute_dtype)                     # (5, 128), cast once

    def layer(h, w_bf16, bias_row):
        # MXU: bf16 x bf16 -> f32 accumulation; the astype is a no-op when h is bf16.
        y = jnp.dot(h.astype(jnp.bfloat16), w_bf16,
                    preferred_element_type=jnp.float32)
        y = y.astype(compute_dtype) + bias_row               # VPU bias-add
        return jnp.maximum(y, 0)                             # ReLU (same dtype)

    h = layer(x_ref[...], w1_ref[...], b[0:1, :])            # fc1
    for k in range(3):                                       # fc2..fc4 (stacked weights)
        h = layer(h, wmid_ref[k], b[k + 1:k + 2, :])
    h = layer(h, w5_ref[...], b[4:5, :])                     # fc5 (+ReLU, per the spec)

    # sigmoid(x) == 0.5*tanh(0.5*x) + 0.5 : one EUP transcendental instead of exp+recip.
    s = 0.5 * jnp.tanh(0.5 * h) + 0.5
    # Narrow store: only the first `action_size` lanes carry real outputs.
    out_ref[...] = s[:, :action_size].astype(out_ref.dtype)


def qnetwork_forward(x, params, action_size, *, block_batch=8192):
    """x: (B, state_size) f32. params = (w1, w_mid, w5, b_all) as packed by init_params."""
    w1, w_mid, w5, b_all = params
    assert action_size <= HIDDEN, "lane-padded fc5 packing requires action_size <= 128"
    B, S = x.shape

    kind = _device_kind()
    is_v7 = ("v7" in kind) or ("7x" in kind)
    # bf16 elementwise only where the VALU/EUP are bf16-native (v6e / v7x); f32 on v5e.
    compute_dtype = jnp.bfloat16 if (("v6" in kind) or is_v7) else jnp.float32

    # ---- batch tiling --------------------------------------------------------
    B8 = _round_up(max(B, 1), 8)
    TB = _round_up(min(block_batch, B8), 8)
    if is_v7:
        # Keep >= 2 grid steps so both v7x TensorCores get work on the parallel axis.
        TB = min(TB, max(8, _round_up(pl.cdiv(B8, 2), 8)))
    B_pad = _round_up(B8, TB)
    if B_pad != B:
        x = jnp.pad(x, ((0, B_pad - B), (0, 0)))

    # Raise scoped VMEM so TB up to 8192 fits everywhere (v5e default is only 16 MiB);
    # leave headroom under v7x's 64 MiB physical VMEM.
    vmem_limit = (48 if is_v7 else 64) * 1024 * 1024

    kernel = functools.partial(qnet_kernel, compute_dtype=compute_dtype,
                               action_size=action_size)

    out = pl.pallas_call(
        kernel,
        out_shape=jax.ShapeDtypeStruct((B_pad, action_size), jnp.float32),
        grid_spec=pltpu.PrefetchScalarGridSpec(
            num_scalar_prefetch=0,
            grid=(B_pad // TB,),
            in_specs=[
                pl.BlockSpec((TB, S), lambda i: (i, 0)),                 # batch-tiled input
                pl.BlockSpec((S, HIDDEN), lambda i: (0, 0)),             # fc1 W, VMEM-resident
                pl.BlockSpec((3, HIDDEN, HIDDEN), lambda i: (0, 0, 0)),  # fc2..fc4 W, resident
                pl.BlockSpec((HIDDEN, HIDDEN), lambda i: (0, 0)),        # fc5 W (lane-padded)
                pl.BlockSpec((5, HIDDEN), lambda i: (0, 0)),             # biases, resident
            ],
            out_specs=pl.BlockSpec((TB, action_size), lambda i: (i, 0)),  # narrow output tile
        ),
        compiler_params=pltpu.CompilerParams(
            dimension_semantics=("parallel",),   # shard batch tiles across TCs on v7x
            vmem_limit_bytes=vmem_limit,
        ),
    )(x, w1, w_mid, w5, b_all)

    return out[:B]


def init_params(key, state_size, action_size, hidden=HIDDEN):
    """nn.Linear-style init (uniform(+/- 1/sqrt(fan_in))), packed for the kernel:
       w1 (S,128) bf16, w_mid (3,128,128) bf16, w5 (128,128) bf16 zero-padded past
       action_size, b_all (5,128) f32 zero-padded past action_size in row 4."""
    assert action_size <= hidden, "lane-padded fc5 packing requires action_size <= 128"
    dims = [(state_size, hidden), (hidden, hidden), (hidden, hidden),
            (hidden, hidden), (hidden, action_size)]
    ws, bs = [], []
    for fan_in, fan_out in dims:
        key, kw, kb = jax.random.split(key, 3)
        bound = float(fan_in) ** -0.5
        ws.append(jax.random.uniform(kw, (fan_in, fan_out), jnp.float32, -bound, bound))
        bs.append(jax.random.uniform(kb, (fan_out,), jnp.float32, -bound, bound))

    w1 = ws[0].astype(jnp.bfloat16)
    w_mid = jnp.stack(ws[1:4]).astype(jnp.bfloat16)                  # (3, 128, 128)
    w5 = jnp.zeros((hidden, hidden), jnp.float32)
    w5 = w5.at[:, :action_size].set(ws[4]).astype(jnp.bfloat16)      # lane-padded fc5
    b_all = jnp.zeros((5, hidden), jnp.float32)
    for i in range(4):
        b_all = b_all.at[i, :].set(bs[i])
    b_all = b_all.at[4, :action_size].set(bs[4])
    return (w1, w_mid, w5, b_all)


def reference_forward(x, params, action_size):
    """Pure-JAX f32 reference mirroring the PyTorch forward (bf16 weight quantization is
    shared with the kernel; activations stay f32 here)."""
    w1, w_mid, w5, b_all = params
    weights = [w1] + [w_mid[i] for i in range(w_mid.shape[0])] + [w5]
    h = x
    for i, w in enumerate(weights):
        h = jnp.maximum(jnp.dot(h, w.astype(jnp.float32)) + b_all[i], 0.0)
    return jax.nn.sigmoid(h)[:, :action_size]


if __name__ == "__main__":
    key = jax.random.PRNGKey(0)
    batch, state_size, action_size = 2, 8, 4

    key, kx = jax.random.split(key)
    x = jax.random.normal(kx, (batch, state_size), jnp.float32)
    params = init_params(key, state_size, action_size)

    out = jax.block_until_ready(qnetwork_forward(x, params, action_size))
    ref = reference_forward(x, params, action_size)

    assert out.shape == (batch, action_size)
    # bf16 MXU operands (+ bf16 elementwise on v6e/v7x) vs f32 reference -> modest tolerance.
    assert jnp.allclose(out, ref, atol=2e-2, rtol=2e-2), "mismatch vs JAX reference"
    print("KERNEL_OK")
</pallas_src>

<mosaic_0001>
module attributes {stable_mosaic.version = 11 : i64} {
  func.func @qnet_kernel(%arg0: i32, %arg1: memref<8x8xf32, #tpu.memory_space<vmem>>, %arg2: memref<8x128xbf16, #tpu.memory_space<vmem>>, %arg3: memref<3x128x128xbf16, #tpu.memory_space<vmem>>, %arg4: memref<128x128xbf16, #tpu.memory_space<vmem>>, %arg5: memref<5x128xf32, #tpu.memory_space<vmem>>, %arg6: memref<8x4xf32, #tpu.memory_space<vmem>>) attributes {dimension_semantics = [#tpu.dimension_semantics<parallel>], iteration_bounds = array<i64: 1>, scalar_prefetch = 0 : i64, scratch_operands = 0 : i64, tpu.core_type = #tpu.core_type<tc>, window_params = [{transform_indices = @transform_0, window_bounds = array<i64: 8, 8>}, {pipeline_mode = #tpu.pipeline_mode<synchronous>, transform_indices = @transform_1, window_bounds = array<i64: 8, 128>}, {pipeline_mode = #tpu.pipeline_mode<synchronous>, transform_indices = @transform_2, window_bounds = array<i64: 3, 128, 128>}, {pipeline_mode = #tpu.pipeline_mode<synchronous>, transform_indices = @transform_3, window_bounds = array<i64: 128, 128>}, {pipeline_mode = #tpu.pipeline_mode<synchronous>, transform_indices = @transform_4, window_bounds = array<i64: 5, 128>}, {transform_indices = @transform_5, window_bounds = array<i64: 8, 4>}]} {
    %c0 = arith.constant 0 : index
    %c0_0 = arith.constant 0 : index
    %0 = vector.load %arg5[%c0, %c0_0] : memref<5x128xf32, #tpu.memory_space<vmem>>, vector<5x128xf32>
    %c0_1 = arith.constant 0 : index
    %c0_2 = arith.constant 0 : index
    %1 = vector.load %arg1[%c0_1, %c0_2] : memref<8x8xf32, #tpu.memory_space<vmem>>, vector<8x8xf32>
    %c0_3 = arith.constant 0 : index
    %c0_4 = arith.constant 0 : index
    %2 = vector.load %arg2[%c0_3, %c0_4] : memref<8x128xbf16, #tpu.memory_space<vmem>>, vector<8x128xbf16>
    %3 = vector.extract_strided_slice %0 {offsets = [0, 0], sizes = [1, 128], strides = [1, 1]} : vector<5x128xf32> to vector<1x128xf32>
    %4 = arith.truncf %1 : vector<8x8xf32> to vector<8x8xbf16>
    %cst = arith.constant dense<0.000000e+00> : vector<8x128xf32>
    %5 = tpu.matmul %4, %2, %cst {dimension_numbers = #tpu.dot_dimension_numbers<[1], [0], [0], [1], [0, 0, 1, 1], [], []>} : vector<8x8xbf16>, vector<8x128xbf16>, vector<8x128xf32> -> vector<8x128xf32>
    %6 = vector.broadcast %3 : vector<1x128xf32> to vector<8x128xf32>
    %7 = arith.addf %5, %6 : vector<8x128xf32>
    %cst_5 = arith.constant 0.000000e+00 : f32
    %8 = vector.broadcast %cst_5 : f32 to vector<8x128xf32>
    %9 = arith.maximumf %7, %8 : vector<8x128xf32>
    %c0_6 = arith.constant 0 : index
    %c0_7 = arith.constant 0 : index
    %c0_8 = arith.constant 0 : index
    %10 = vector.load %arg3[%c0_6, %c0_7, %c0_8] : memref<3x128x128xbf16, #tpu.memory_space<vmem>>, vector<1x128x128xbf16>
    %11 = vector.shape_cast %10 : vector<1x128x128xbf16> to vector<128x128xbf16>
    %12 = vector.extract_strided_slice %0 {offsets = [1, 0], sizes = [1, 128], strides = [1, 1]} : vector<5x128xf32> to vector<1x128xf32>
    %13 = arith.truncf %9 : vector<8x128xf32> to vector<8x128xbf16>
    %cst_9 = arith.constant dense<0.000000e+00> : vector<8x128xf32>
    %14 = tpu.matmul %13, %11, %cst_9 {dimension_numbers = #tpu.dot_dimension_numbers<[1], [0], [0], [1], [0, 0, 1, 1], [], []>} : vector<8x128xbf16>, vector<128x128xbf16>, vector<8x128xf32> -> vector<8x128xf32>
    %15 = vector.broadcast %12 : vector<1x128xf32> to vector<8x128xf32>
    %16 = arith.addf %14, %15 : vector<8x128xf32>
    %cst_10 = arith.constant 0.000000e+00 : f32
    %17 = vector.broadcast %cst_10 : f32 to vector<8x128xf32>
    %18 = arith.maximumf %16, %17 : vector<8x128xf32>
    %c1 = arith.constant 1 : index
    %c0_11 = arith.constant 0 : index
    %c0_12 = arith.constant 0 : index
    %19 = vector.load %arg3[%c1, %c0_11, %c0_12] : memref<3x128x128xbf16, #tpu.memory_space<vmem>>, vector<1x128x128xbf16>
    %20 = vector.shape_cast %19 : vector<1x128x128xbf16> to vector<128x128xbf16>
    %21 = vector.extract_strided_slice %0 {offsets = [2, 0], sizes = [1, 128], strides = [1, 1]} : vector<5x128xf32> to vector<1x128xf32>
    %22 = arith.truncf %18 : vector<8x128xf32> to vector<8x128xbf16>
    %cst_13 = arith.constant dense<0.000000e+00> : vector<8x128xf32>
    %23 = tpu.matmul %22, %20, %cst_13 {dimension_numbers = #tpu.dot_dimension_numbers<[1], [0], [0], [1], [0, 0, 1, 1], [], []>} : vector<8x128xbf16>, vector<128x128xbf16>, vector<8x128xf32> -> vector<8x128xf32>
    %24 = vector.broadcast %21 : vector<1x128xf32> to vector<8x128xf32>
    %25 = arith.addf %23, %24 : vector<8x128xf32>
    %cst_14 = arith.constant 0.000000e+00 : f32
    %26 = vector.broadcast %cst_14 : f32 to vector<8x128xf32>
    %27 = arith.maximumf %25, %26 : vector<8x128xf32>
    %c2 = arith.constant 2 : index
    %c0_15 = arith.constant 0 : index
    %c0_16 = arith.constant 0 : index
    %28 = vector.load %arg3[%c2, %c0_15, %c0_16] : memref<3x128x128xbf16, #tpu.memory_space<vmem>>, vector<1x128x128xbf16>
    %29 = vector.shape_cast %28 : vector<1x128x128xbf16> to vector<128x128xbf16>
    %30 = vector.extract_strided_slice %0 {offsets = [3, 0], sizes = [1, 128], strides = [1, 1]} : vector<5x128xf32> to vector<1x128xf32>
    %31 = arith.truncf %27 : vector<8x128xf32> to vector<8x128xbf16>
    %cst_17 = arith.constant dense<0.000000e+00> : vector<8x128xf32>
    %32 = tpu.matmul %31, %29, %cst_17 {dimension_numbers = #tpu.dot_dimension_numbers<[1], [0], [0], [1], [0, 0, 1, 1], [], []>} : vector<8x128xbf16>, vector<128x128xbf16>, vector<8x128xf32> -> vector<8x128xf32>
    %33 = vector.broadcast %30 : vector<1x128xf32> to vector<8x128xf32>
    %34 = arith.addf %32, %33 : vector<8x128xf32>
    %cst_18 = arith.constant 0.000000e+00 : f32
    %35 = vector.broadcast %cst_18 : f32 to vector<8x128xf32>
    %36 = arith.maximumf %34, %35 : vector<8x128xf32>
    %c0_19 = arith.constant 0 : index
    %c0_20 = arith.constant 0 : index
    %37 = vector.load %arg4[%c0_19, %c0_20] : memref<128x128xbf16, #tpu.memory_space<vmem>>, vector<128x128xbf16>
    %38 = vector.extract_strided_slice %0 {offsets = [4, 0], sizes = [1, 128], strides = [1, 1]} : vector<5x128xf32> to vector<1x128xf32>
    %39 = arith.truncf %36 : vector<8x128xf32> to vector<8x128xbf16>
    %cst_21 = arith.constant dense<0.000000e+00> : vector<8x128xf32>
    %40 = tpu.matmul %39, %37, %cst_21 {dimension_numbers = #tpu.dot_dimension_numbers<[1], [0], [0], [1], [0, 0, 1, 1], [], []>} : vector<8x128xbf16>, vector<128x128xbf16>, vector<8x128xf32> -> vector<8x128xf32>
    %41 = vector.broadcast %38 : vector<1x128xf32> to vector<8x128xf32>
    %42 = arith.addf %40, %41 : vector<8x128xf32>
    %cst_22 = arith.constant 0.000000e+00 : f32
    %43 = vector.broadcast %cst_22 : f32 to vector<8x128xf32>
    %44 = arith.maximumf %42, %43 : vector<8x128xf32>
    %cst_23 = arith.constant 5.000000e-01 : f32
    %45 = vector.broadcast %cst_23 : f32 to vector<8x128xf32>
    %46 = arith.mulf %45, %44 : vector<8x128xf32>
    %47 = math.tanh %46 : vector<8x128xf32>
    %cst_24 = arith.constant 5.000000e-01 : f32
    %48 = vector.broadcast %cst_24 : f32 to vector<8x128xf32>
    %49 = arith.mulf %48, %47 : vector<8x128xf32>
    %cst_25 = arith.constant 5.000000e-01 : f32
    %50 = vector.broadcast %cst_25 : f32 to vector<8x128xf32>
    %51 = arith.addf %49, %50 : vector<8x128xf32>
    %52 = vector.extract_strided_slice %51 {offsets = [0, 0], sizes = [8, 4], strides = [1, 1]} : vector<8x128xf32> to vector<8x4xf32>
    %c0_26 = arith.constant 0 : index
    %c0_27 = arith.constant 0 : index
    %53 = vector.load %arg6[%c0_26, %c0_27] : memref<8x4xf32, #tpu.memory_space<vmem>>, vector<8x4xf32>
    tpu.vector_store %arg6[%c0_26, %c0_27], %52 {strides = array<i32>} : memref<8x4xf32, #tpu.memory_space<vmem>>, vector<8x4xf32>,
    return
  }
  func.func @transform_0(%arg0: i32) -> (i32, i32) {
    %c0_i32 = arith.constant 0 : i32
    %c0_i32_0 = arith.constant 0 : i32
    return %arg0, %c0_i32 : i32, i32
  }
  func.func @transform_1(%arg0: i32) -> (i32, i32) {
    %c0_i32 = arith.constant 0 : i32
    %c0_i32_0 = arith.constant 0 : i32
    %c0_i32_1 = arith.constant 0 : i32
    return %c0_i32, %c0_i32_0 : i32, i32
  }
  func.func @transform_2(%arg0: i32) -> (i32, i32, i32) {
    %c0_i32 = arith.constant 0 : i32
    %c0_i32_0 = arith.constant 0 : i32
    %c0_i32_1 = arith.constant 0 : i32
    %c0_i32_2 = arith.constant 0 : i32
    return %c0_i32, %c0_i32_0, %c0_i32_1 : i32, i32, i32
  }
  func.func @transform_3(%arg0: i32) -> (i32, i32) {
    %c0_i32 = arith.constant 0 : i32
    %c0_i32_0 = arith.constant 0 : i32
    %c0_i32_1 = arith.constant 0 : i32
    return %c0_i32, %c0_i32_0 : i32, i32
  }
  func.func @transform_4(%arg0: i32) -> (i32, i32) {
    %c0_i32 = arith.constant 0 : i32
    %c0_i32_0 = arith.constant 0 : i32
    %c0_i32_1 = arith.constant 0 : i32
    return %c0_i32, %c0_i32_0 : i32, i32
  }
  func.func @transform_5(%arg0: i32) -> (i32, i32) {
    %c0_i32 = arith.constant 0 : i32
    %c0_i32_0 = arith.constant 0 : i32
    return %arg0, %c0_i32 : i32, i32
  }
}

</mosaic_0001>

<bundles_post_ra>
// kernel: tpu_custom_call.1
= control target key start
LH: loop header
LB: loop body
LE: loop exit
PB: predicated region body
PF: predicated region fallthrough
CT: control target
= control target key end

     0   :  { %10 = vsyncpa [#allocation3], 0  ;;  %s813_s0 = inlined_call_operand.hbm [shape: f32[8,8], index: 0, kind: input, shape index: {}]   ;;  %s814_s1 = inlined_call_operand.hbm [shape: bf16[8,128], index: 1, kind: input, shape index: {}]   ;;  %s815_s2 = inlined_call_operand.hbm [shape: bf16[3,128,128], index: 2, kind: input, shape index: {}]   ;;  %s816_s3 = inlined_call_operand.hbm [shape: bf16[128,128], index: 3, kind: input, shape index: {}]   ;;  %s817_s4 = inlined_call_operand.hbm [shape: f32[5,128], index: 4, kind: input, shape index: {}]   ;;  %s818_s5 = inlined_call_operand.vmem [shape: f32[8,4], index: 5, kind: output, shape index: {}]  }
   0x1   :  { %11 = vsyncpa [#allocation5], 0  ;;  %s29_s20 = sshll.u32 %s814_s1, 4  ;;  %s30_s20 = int_to_ptr.hbm [resolvable:$true] %s29_s20 }
   0x2   :  { %12 = vsyncpa [#allocation8], 0  ;;  %s751_s21 = smov [#allocation4]   ;;  %s52_s25 = sshll.u32 %s816_s3, 4  ;;  %s53_s25 = int_to_ptr.hbm [resolvable:$true] %s52_s25 }
   0x3   :  { %s31_s22 = sshll.u32 %s751_s21, 4  ;;  %s752_s26 = smov [#allocation7]   ;;  %s32_s22 = int_to_ptr.vmem [resolvable:$true] %s31_s22 }
   0x4   :  { %34 = dma.hbm_to_vmem [thread:$0]  %s30_s20, 64, %s32_s22, [#allocation5]  }
   0x5   :  { %s54_s27 = sshll.u32 %s752_s26, 4  ;;  %s18_s30 = sshll.u32 %s813_s0, 4  ;;  %s55_s27 = int_to_ptr.vmem [resolvable:$true] %s54_s27  ;;  %s19_s30 = int_to_ptr.hbm [resolvable:$true] %s18_s30 }
   0x6   :  { %s753_s1 = smov 64   ;;  %s754_s6 = smov 4  }
   0x7   :  { %60 = dma.hbm_to_vmem [thread:$0]  %s53_s25, 1024, %s55_s27, [#allocation8], %s753_s1, %s753_s1, %s754_s6  }
   0x8   :  { %s39_s9 = sshll.u32 %s815_s2, 4  ;;  %s755_s10 = smov [#allocation2]   ;;  %s40_s9 = int_to_ptr.hbm [resolvable:$true] %s39_s9 }
   0x9   :  { %s20_s11 = sshll.u32 %s755_s10, 4  ;;  %s756_s3 = smov [#allocation6]   ;;  %s21_s11 = int_to_ptr.vmem [resolvable:$true] %s20_s11 }
   0xa   :  { %23 = dma.hbm_to_vmem [thread:$0]  %s19_s30, 128, %s21_s11, [#allocation3]  }
   0xb   :  { %s41_s12 = sshll.u32 %s756_s3, 4  ;;  %s66_s0 = sshll.u32 %s817_s4, 4  ;;  %s42_s12 = int_to_ptr.vmem [resolvable:$true] %s41_s12  ;;  %s67_s0 = int_to_ptr.hbm [resolvable:$true] %s66_s0 }
   0xc   :  { %47 = dma.hbm_to_vmem [thread:$0]  %s40_s9, 3072, %s42_s12, [#allocation5], %s753_s1, %s753_s1, %s754_s6  }
   0xd   :  { %s757_s15 = smov [#allocation9]  }
   0xe   :  { %s68_s16 = sshll.u32 %s757_s15, 4  ;;  %s69_s16 = int_to_ptr.vmem [resolvable:$true] %s68_s16 }
   0xf   :  { %71 = dma.hbm_to_vmem [thread:$0]  %s67_s0, 128, %s69_s16, [#allocation8]  }
  0x10   :  { %745 = dma.done.wait [#allocation3], 128  }
  0x11   :  { %746 = vsyncadd [#allocation3], 4294967168 }
  0x12   :  { %747 = dma.done.wait [#allocation5], 3136  }
  0x13   :  { %748 = vsyncadd [#allocation5], 4294964160 }
  0x14   :  { %749 = dma.done.wait [#allocation8], 1152  }
  0x15   :  { %750 = vsyncadd [#allocation8], 4294966144  ;;  %vm102_vm0 = vcmask 1043456   ;;  %v95_v0 = vld [vmem:[#allocation4] sm:$0xf]  ;;  %v94_v1 = vld [vmem:[#allocation2] sm:$0xff] }
  0x16   :  { %v591_v2 = vld [vmem:[#allocation6 + $0x38] sm:$0xff]  ;;  %v104_v3 = vsel %vm102_vm0, %v95_v0, 0  ;;  %v96_v4 = vpack.c.bf16 %v94_v1, %v94_v1  ;;  %vm98_vm1 = vcmask 64512   ;;  %v590_v5 = vld [vmem:[#allocation6 + $0x30] sm:$0xff]  ;;  %v589_v6 = vld [vmem:[#allocation6 + $0x28] sm:$0xff]  ;;  %vm446_vm2 = vcmask 31744  }
  0x17   :  { %113 = vmatpush.bf16.msra.mxu0 %v104_v3  ;;  %186 = vmatpush.bf16.msra.mxu1 %v591_v2  ;;  %v588_v7 = vld [vmem:[#allocation6 + $0x20] sm:$0xff]  ;;  %v587_v8 = vld [vmem:[#allocation6 + $0x18] sm:$0xff]  ;;  %v586_v9 = vld [vmem:[#allocation6 + $0x10] sm:$0xff] }
  0x18   :  { %v585_v10 = vld [vmem:[#allocation6 + $0x8] sm:$0xff]  ;;  %v584_v11 = vld [vmem:[#allocation6] sm:$0xff]  ;;  %v599_v12 = vld [vmem:[#allocation6 + $0x78] sm:$0xff] }
  0x19   :  { %267 = vmatpush.bf16.msra.mxu2 %v599_v12  ;;  %v598_v13 = vld [vmem:[#allocation6 + $0x70] sm:$0xff]  ;;  %v597_v14 = vld [vmem:[#allocation6 + $0x68] sm:$0xff]  ;;  %v596_v15 = vld [vmem:[#allocation6 + $0x60] sm:$0xff] }
  0x1a   :  { %455 = vmatmul.msk.bf16.vlgmr.msra.gmra.mxu0 %vm98_vm1, %v96_v4  ;;  %v595_v16 = vld [vmem:[#allocation6 + $0x58] sm:$0xff]  ;;  %v803_v17 = vld [vmem:[#allocation9] sm:$0x1f]  ;;  %v594_v18 = vld [vmem:[#allocation6 + $0x50] sm:$0xff] }
  0x1b   :  { %187 = vmatpush.bf16.msra.mxu1 %v590_v5  ;;  %v97_v19 = vperm.slane %v803_v17, 0  ;;  %v593_v25 = vld [vmem:[#allocation6 + $0x48] sm:$0xff]  ;;  %v592_v26 = vld [vmem:[#allocation6 + $0x40] sm:$0xff]  ;;  %v607_v27 = vld [vmem:[#allocation6 + $0xb8] sm:$0xff]  ;;  %v137_v33 = vperm.slane %v803_v17, 1  ;;  %v218_v47 = vperm.slane %v803_v17, 2 }
  0x1c   :  { %348 = vmatpush.bf16.msra.mxu3 %v607_v27  ;;  %v606_v28 = vld [vmem:[#allocation6 + $0xb0] sm:$0xff]  ;;  %v605_v29 = vld [vmem:[#allocation6 + $0xa8] sm:$0xff]  ;;  %v604_v30 = vld [vmem:[#allocation6 + $0xa0] sm:$0xff]  ;;  %v299_v55 = vperm.slane %v803_v17, 3  ;;  %v379_v61 = vperm.slane %v803_v17, 4 }
  0x1d   :  { %268 = vmatpush.bf16.msra.mxu2 %v598_v13  ;;  %v603_v31 = vld [vmem:[#allocation6 + $0x98] sm:$0xff]  ;;  %v602_v32 = vld [vmem:[#allocation6 + $0x90] sm:$0xff]  ;;  %v601_v39 = vld [vmem:[#allocation6 + $0x88] sm:$0xff] }
  0x1e   :  { %v600_v40 = vld [vmem:[#allocation6 + $0x80] sm:$0xff]  ;;  %v615_v41 = vld [vmem:[#allocation7 + $0x38] sm:$0xff]  ;;  %v614_v42 = vld [vmem:[#allocation7 + $0x30] sm:$0xff] }
  0x1f   :  { %188 = vmatpush.bf16.msra.mxu1 %v589_v6  ;;  %428 = vmatpush.bf16.msrb.mxu0 %v615_v41  ;;  %v613_v43 = vld [vmem:[#allocation7 + $0x28] sm:$0xff]  ;;  %v612_v44 = vld [vmem:[#allocation7 + $0x20] sm:$0xff]  ;;  %v611_v45 = vld [vmem:[#allocation7 + $0x18] sm:$0xff] }
  0x20   :  { %349 = vmatpush.bf16.msra.mxu3 %v606_v28  ;;  %v610_v46 = vld [vmem:[#allocation7 + $0x10] sm:$0xff]  ;;  %v609_v53 = vld [vmem:[#allocation7 + $0x8] sm:$0xff]  ;;  %v608_v54 = vld [vmem:[#allocation7] sm:$0xff] }
  0x21   :  { %269 = vmatpush.bf16.msra.mxu2 %v597_v14 }
  0x23   :  { %189 = vmatpush.bf16.msra.mxu1 %v588_v7  ;;  %429 = vmatpush.bf16.msrb.mxu0 %v614_v42 }
  0x24   :  { %350 = vmatpush.bf16.msra.mxu3 %v605_v29 }
  0x25   :  { %270 = vmatpush.bf16.msra.mxu2 %v596_v15 }
  0x27   :  { %190 = vmatpush.bf16.msra.mxu1 %v587_v8  ;;  %430 = vmatpush.bf16.msrb.mxu0 %v613_v43 }
  0x28   :  { %351 = vmatpush.bf16.msra.mxu3 %v604_v30 }
  0x29   :  { %271 = vmatpush.bf16.msra.mxu2 %v595_v16 }
  0x2b   :  { %191 = vmatpush.bf16.msra.mxu1 %v586_v9  ;;  %431 = vmatpush.bf16.msrb.mxu0 %v612_v44 }
  0x2c   :  { %352 = vmatpush.bf16.msra.mxu3 %v603_v31 }
  0x2d   :  { %272 = vmatpush.bf16.msra.mxu2 %v594_v18 }
  0x2f   :  { %192 = vmatpush.bf16.msra.mxu1 %v585_v10  ;;  %432 = vmatpush.bf16.msrb.mxu0 %v611_v45 }
  0x30   :  { %353 = vmatpush.bf16.msra.mxu3 %v602_v32 }
  0x31   :  { %273 = vmatpush.bf16.msra.mxu2 %v593_v25 }
  0x33   :  { %193 = vmatpush.bf16.msra.mxu1 %v584_v11  ;;  %433 = vmatpush.bf16.msrb.mxu0 %v610_v46 }
  0x34   :  { %354 = vmatpush.bf16.msra.mxu3 %v601_v39 }
  0x35   :  { %274 = vmatpush.bf16.msra.mxu2 %v592_v26 }
  0x37   :  { %434 = vmatpush.bf16.msrb.mxu0 %v609_v53 }
  0x38   :  { %355 = vmatpush.bf16.msra.mxu3 %v600_v40 }
  0x3b   :  { %435 = vmatpush.bf16.msrb.mxu0 %v608_v54 }
  0x97   :  { %v115_v20 = vpop.f32.mrf.mxu0 }
  0x98   :  { %v116_v21 = vadd.f32 %v115_v20, %v97_v19 }
  0x9a   :  { %v119_v22 = vmax.f32 %v116_v21, 0.0 }
  0x9c   :  { %v136_v23 = vpack.c.bf16 %v119_v22, %v119_v22 }
  0x9e   :  { %194 = vmatmul.bf16.vlgmr.msra.gmra.mxu1 %v136_v23 }
  0x9f   :  { %v117_v24 = vpop.f32.mrf.mxu0 }
 0x11b   :  { %v195_v34 = vpop.f32.mrf.mxu1 }
 0x11c   :  { %v196_v35 = vadd.f32 %v195_v34, %v137_v33 }
 0x11e   :  { %v199_v36 = vmax.f32 %v196_v35, 0.0 }
 0x120   :  { %v217_v37 = vpack.c.bf16 %v199_v36, %v199_v36 }
 0x122   :  { %275 = vmatmul.bf16.vlgmr.msra.gmra.mxu2 %v217_v37 }
 0x123   :  { %v197_v38 = vpop.f32.mrf.mxu1 }
 0x1a5   :  { %v276_v48 = vpop.f32.mrf.mxu2 }
 0x1a6   :  { %v277_v49 = vadd.f32 %v276_v48, %v218_v47 }
 0x1a8   :  { %v280_v50 = vmax.f32 %v277_v49, 0.0 }
 0x1aa   :  { %v298_v51 = vpack.c.bf16 %v280_v50, %v280_v50 }
 0x1ac   :  { %356 = vmatmul.bf16.vlgmr.msra.gmra.mxu3 %v298_v51 }
 0x1ad   :  { %v278_v52 = vpop.f32.mrf.mxu2 }
 0x22f   :  { %v357_v56 = vpop.f32.mrf.mxu3 }
 0x230   :  { %v358_v57 = vadd.f32 %v357_v56, %v299_v55 }
 0x232   :  { %v361_v58 = vmax.f32 %v358_v57, 0.0 }
 0x234   :  { %v378_v59 = vpack.c.bf16 %v361_v58, %v361_v58 }
 0x236   :  { %436 = vmatmul.bf16.vlgmr.msrb.gmra.mxu0 %v378_v59 }
 0x237   :  { %v359_v60 = vpop.f32.mrf.mxu3 }
 0x2b3   :  { %v437_v62 = vpop.f32.mrf.mxu0 }
 0x2b4   :  { %v438_v63 = vadd.f32 %v437_v62, %v379_v61 }
 0x2b6   :  { %v441_v0 = vmax.f32 %v438_v63, 0.0 }
 0x2b8   :  { %v442_v1 = vmul.f32 0.5, %v441_v0 }
 0x2ba   :  { %623 = vtanh.f32 %v442_v1 }
 0x2bb   :  { %v439_v2 = vpop.f32.mrf.mxu0 }
 0x2c0   :  { %v624_v3 = vpop.eup %623 }
 0x2c1   :  { %v444_v4 = vmul.f32 0.5, %v624_v3 }
 0x2c3   :  { %v445_v5 = vadd.f32 0.5, %v444_v4 }
 0x2c5   :  { %447 = vst.msk [vmem:[%s818_s5] sm:$0xff] %vm446_vm2, %v445_v5 }
 0x2c6   :  { %452 = vsyncpa [#allocation3], 1 }
 0x2c7   :  { %453 = vsyncpa [#allocation5], 1 }
 0x2c8   :  { %454 = vsyncpa [#allocation8], 1 }

</bundles_post_ra>
